<compile_context>
chip_gen: v7x
topology: tpu7x:2x2x1
jax: 0.10.0
libtpu: 0.0.40
codegen_flags: <defaults>
</compile_context>

<pallas_src>
import functools

import jax
import jax.numpy as jnp
from jax.experimental import pallas as pl
from jax.experimental.pallas import tpu as pltpu


def _mca_gate_kernel(x_ref, t_ref, scal_ref, o_ref, *, hw, bb):
    # x_ref   : (bb, C, HW)  in x's native dtype
    # t_ref   : (C, C) f32   folded 1 x k_size channel-conv (Toeplitz) matrix
    # scal_ref: (2,)   f32 SMEM = [0.5 + sigmoid(w0), 0.5 + sigmoid(w1)]
    # o_ref   : (bb, C, HW)  in x's native dtype
    a = scal_ref[0]
    b = scal_ref[1]
    inv_n = 1.0 / hw
    # torch .std(dim) is the unbiased std (divide by N-1); HW == 1 -> NaN like torch.
    inv_nm1 = 1.0 / (hw - 1) if hw > 1 else float("nan")

    for i in range(bb):                                    # static unroll over batch block
        xf = x_ref[i].astype(jnp.float32)                  # (C, HW), math in f32

        # One-pass mean / unbiased std (sum and sum-of-squares in one sweep).
        s1 = jnp.sum(xf, axis=-1, keepdims=True)           # (C, 1)
        s2 = jnp.sum(xf * xf, axis=-1, keepdims=True)      # (C, 1)
        mean = s1 * inv_n
        var = (s2 - s1 * mean) * inv_nm1
        std = jnp.sqrt(jnp.maximum(var, 0.0))              # clamp cancellation noise

        # Weighted avg/std mix (VPU scalars from SMEM) + channel conv folded into T.
        f = a * mean + b * std                             # (C, 1)
        conv = jnp.dot(t_ref[...], f, preferred_element_type=jnp.float32)
        gate = 1.0 / (1.0 + jnp.exp(-conv))                # sigmoid, (C, 1)

        # out.expand_as(x); x * out  (broadcast over the lane/spatial axis)
        o_ref[i] = (xf * gate).astype(o_ref.dtype)


def _pick_batch_block(batch, per_batch_bytes, budget_bytes=40 << 20):
    """Largest divisor bb of `batch` whose double-buffered in+out blocks fit the
    VMEM budget, while keeping >= 2 grid steps when batch >= 2 (v7x has 2 TCs)."""
    best = 1
    for bb in range(1, batch + 1):
        if batch % bb:
            continue
        if 4 * bb * per_batch_bytes > budget_bytes:        # 2x in + 2x out buffers
            continue
        if batch >= 2 and batch // bb < 2:
            continue
        best = bb
    return best


def mca_gate(x, conv_w, weight, k_size):
    """MCAGate forward.  x: (B, C, H, W) NCHW (any float dtype), conv_w: (k_size,),
    weight: (2,).  Returns an array with x's shape and dtype."""
    B, C, H, W = x.shape
    HW = H * W
    pad = (k_size - 1) // 2

    # Single Toeplitz matrix equivalent to Conv2d(1, 1, (1, k_size), padding=(0, pad),
    # bias=False) applied along the channel axis (what the permutes achieve):
    #   conv[j] = sum_t conv_w[t] * f[j + t - pad]   =>   T[j, i] = conv_w[i - j + pad]
    jj = jnp.arange(C)[:, None]                    # output channel index
    ii = jnp.arange(C)[None, :]                    # input channel index
    t_idx = ii - jj + pad
    valid = (t_idx >= 0) & (t_idx < k_size)
    T = jnp.where(valid,
                  conv_w.astype(jnp.float32)[jnp.clip(t_idx, 0, k_size - 1)],
                  0.0)

    # out = 1/2*(avg+std) + w0*avg + w1*std, with w = sigmoid(weight):
    scal = 0.5 + jax.nn.sigmoid(weight.astype(jnp.float32))   # (2,) -> SMEM scalars

    x_flat = x.reshape(B, C, HW)                   # metadata-only, native dtype

    itemsize = jnp.dtype(x.dtype).itemsize
    bb = _pick_batch_block(B, C * HW * itemsize)
    grid = (B // bb,)

    # VMEM budget: in+out blocks double-buffered + T (counted 2x, conservative) + margin.
    needed = 4 * bb * C * HW * itemsize + 2 * C * C * 4
    vmem_limit = int(min(max(needed + (4 << 20), 16 << 20), 100 << 20))

    kernel = functools.partial(_mca_gate_kernel, hw=HW, bb=bb)

    out = pl.pallas_call(
        kernel,
        out_shape=jax.ShapeDtypeStruct((B, C, HW), x.dtype),
        grid_spec=pltpu.PrefetchScalarGridSpec(
            num_scalar_prefetch=0,
            grid=grid,
            in_specs=[
                pl.BlockSpec((bb, C, HW), lambda i: (i, 0, 0)),
                pl.BlockSpec((C, C), lambda i: (0, 0)),           # constant -> revisited
                pl.BlockSpec(memory_space=pltpu.MemorySpace.SMEM),  # [a, b] scalars
            ],
            out_specs=pl.BlockSpec((bb, C, HW), lambda i: (i, 0, 0)),
        ),
        compiler_params=pltpu.CompilerParams(
            dimension_semantics=("parallel",),
            vmem_limit_bytes=vmem_limit,
        ),
    )(x_flat, T, scal)

    return out.reshape(B, C, H, W)


def mca_gate_reference(x, conv_w, weight, k_size):
    """Pure-JAX mirror of the PyTorch forward, used only as a correctness check."""
    B, C, H, W = x.shape
    pad = (k_size - 1) // 2
    flat = x.reshape(B, C, -1).astype(jnp.float32)
    avg = jnp.mean(flat, axis=2)                             # (B, C)
    std = jnp.std(flat, axis=2, ddof=1)                      # unbiased like torch
    w = jax.nn.sigmoid(weight.astype(jnp.float32))
    out = 0.5 * (avg + std) + w[0] * avg + w[1] * std        # (B, C)
    out_p = jnp.pad(out, ((0, 0), (pad, pad)))
    conv = jnp.zeros_like(out)
    for t in range(k_size):
        conv = conv + conv_w[t] * out_p[:, t:t + C]
    gate = jax.nn.sigmoid(conv)                              # (B, C)
    return (x.astype(jnp.float32) * gate[:, :, None, None]).astype(x.dtype)


if __name__ == "__main__":
    key = jax.random.PRNGKey(0)
    kx, kw, kc = jax.random.split(key, 3)

    B, C, H, W = 2, 8, 16, 16
    k_size = 3

    x = jax.random.normal(kx, (B, C, H, W), dtype=jnp.float32)
    # nn.Parameter(torch.rand(2)): uniform [0, 1)
    weight = jax.random.uniform(kw, (2,), dtype=jnp.float32)
    # Conv2d(1, 1, (1, k_size), bias=False) weight, flattened to (k_size,)
    conv_w = jax.random.normal(kc, (k_size,), dtype=jnp.float32) * 0.5

    y = mca_gate(x, conv_w, weight, k_size)
    y = jax.block_until_ready(y)

    y_ref = mca_gate_reference(x, conv_w, weight, k_size)
    max_err = float(jnp.max(jnp.abs(y - y_ref)))
    assert jnp.allclose(y, y_ref, atol=2e-5, rtol=1e-5), max_err

    print("KERNEL_OK")
</pallas_src>

<mosaic_0001>
module attributes {stable_mosaic.version = 11 : i64} {
  func.func @_mca_gate_kernel(%arg0: i32, %arg1: memref<1x8x256xf32, #tpu.memory_space<vmem>>, %arg2: memref<8x8xf32, #tpu.memory_space<vmem>>, %arg3: memref<2xf32, #tpu.memory_space<smem>>, %arg4: memref<1x8x256xf32, #tpu.memory_space<vmem>>) attributes {dimension_semantics = [#tpu.dimension_semantics<parallel>], iteration_bounds = array<i64: 2>, scalar_prefetch = 0 : i64, scratch_operands = 0 : i64, tpu.core_type = #tpu.core_type<tc>, window_params = [{transform_indices = @transform_0, window_bounds = array<i64: 1, 8, 256>}, {pipeline_mode = #tpu.pipeline_mode<synchronous>, transform_indices = @transform_1, window_bounds = array<i64: 8, 8>}, {transform_indices = @transform_2, window_bounds = array<i64: 2>}, {transform_indices = @transform_3, window_bounds = array<i64: 1, 8, 256>}]} {
    %c0 = arith.constant 0 : index
    %0 = memref.load %arg3[%c0] : memref<2xf32, #tpu.memory_space<smem>>
    %c1 = arith.constant 1 : index
    %1 = memref.load %arg3[%c1] : memref<2xf32, #tpu.memory_space<smem>>
    %c0_0 = arith.constant 0 : index
    %c0_1 = arith.constant 0 : index
    %c0_2 = arith.constant 0 : index
    %2 = vector.load %arg1[%c0_0, %c0_1, %c0_2] : memref<1x8x256xf32, #tpu.memory_space<vmem>>, vector<1x8x256xf32>
    %3 = vector.shape_cast %2 : vector<1x8x256xf32> to vector<8x256xf32>
    %cst = arith.constant dense<0.000000e+00> : vector<8xf32>
    %4 = vector.multi_reduction <add>, %3, %cst [1] : vector<8x256xf32> to vector<8xf32>
    %5 = vector.shape_cast %4 : vector<8xf32> to vector<8x1xf32>
    %6 = arith.mulf %3, %3 : vector<8x256xf32>
    %cst_3 = arith.constant dense<0.000000e+00> : vector<8xf32>
    %7 = vector.multi_reduction <add>, %6, %cst_3 [1] : vector<8x256xf32> to vector<8xf32>
    %8 = vector.shape_cast %7 : vector<8xf32> to vector<8x1xf32>
    %cst_4 = arith.constant 3.906250e-03 : f32
    %9 = vector.broadcast %cst_4 : f32 to vector<8x1xf32>
    %10 = arith.mulf %5, %9 : vector<8x1xf32>
    %11 = arith.mulf %5, %10 : vector<8x1xf32>
    %12 = arith.subf %8, %11 : vector<8x1xf32>
    %cst_5 = arith.constant 0.00392156886 : f32
    %13 = vector.broadcast %cst_5 : f32 to vector<8x1xf32>
    %14 = arith.mulf %12, %13 : vector<8x1xf32>
    %cst_6 = arith.constant 0.000000e+00 : f32
    %15 = vector.broadcast %cst_6 : f32 to vector<8x1xf32>
    %16 = arith.maximumf %14, %15 : vector<8x1xf32>
    %17 = math.sqrt %16 : vector<8x1xf32>
    %18 = vector.broadcast %0 : f32 to vector<8x1xf32>
    %19 = arith.mulf %18, %10 : vector<8x1xf32>
    %20 = vector.broadcast %1 : f32 to vector<8x1xf32>
    %21 = arith.mulf %20, %17 : vector<8x1xf32>
    %22 = arith.addf %19, %21 : vector<8x1xf32>
    %c0_7 = arith.constant 0 : index
    %c0_8 = arith.constant 0 : index
    %23 = vector.load %arg2[%c0_7, %c0_8] : memref<8x8xf32, #tpu.memory_space<vmem>>, vector<8x8xf32>
    %cst_9 = arith.constant dense<0.000000e+00> : vector<8x1xf32>
    %24 = tpu.matmul %23, %22, %cst_9 {dimension_numbers = #tpu.dot_dimension_numbers<[1], [0], [0], [1], [0, 0, 1, 1], [], []>} : vector<8x8xf32>, vector<8x1xf32>, vector<8x1xf32> -> vector<8x1xf32>
    %cst_10 = arith.constant 0.000000e+00 : f32
    %25 = vector.broadcast %cst_10 : f32 to vector<8x1xf32>
    %26 = arith.subf %25, %24 : vector<8x1xf32>
    %27 = math.exp %26 : vector<8x1xf32>
    %cst_11 = arith.constant 1.000000e+00 : f32
    %28 = vector.broadcast %cst_11 : f32 to vector<8x1xf32>
    %29 = arith.addf %28, %27 : vector<8x1xf32>
    %cst_12 = arith.constant 1.000000e+00 : f32
    %30 = vector.broadcast %cst_12 : f32 to vector<8x1xf32>
    %31 = arith.divf %30, %29 : vector<8x1xf32>
    %32 = vector.broadcast %31 : vector<8x1xf32> to vector<8x256xf32>
    %33 = arith.mulf %3, %32 : vector<8x256xf32>
    %c0_13 = arith.constant 0 : index
    %c0_14 = arith.constant 0 : index
    %c0_15 = arith.constant 0 : index
    %34 = vector.load %arg4[%c0_13, %c0_14, %c0_15] : memref<1x8x256xf32, #tpu.memory_space<vmem>>, vector<1x8x256xf32>
    %35 = vector.shape_cast %34 : vector<1x8x256xf32> to vector<8x256xf32>
    %36 = vector.shape_cast %33 : vector<8x256xf32> to vector<1x8x256xf32>
    tpu.vector_store %arg4[%c0_13, %c0_14, %c0_15], %36 {strides = array<i32>} : memref<1x8x256xf32, #tpu.memory_space<vmem>>, vector<1x8x256xf32>,
    return
  }
  func.func @transform_0(%arg0: i32) -> (i32, i32, i32) {
    %c0_i32 = arith.constant 0 : i32
    %c0_i32_0 = arith.constant 0 : i32
    %c0_i32_1 = arith.constant 0 : i32
    return %arg0, %c0_i32, %c0_i32_0 : i32, i32, i32
  }
  func.func @transform_1(%arg0: i32) -> (i32, i32) {
    %c0_i32 = arith.constant 0 : i32
    %c0_i32_0 = arith.constant 0 : i32
    %c0_i32_1 = arith.constant 0 : i32
    return %c0_i32, %c0_i32_0 : i32, i32
  }
  func.func @transform_2(%arg0: i32) -> i32 {
    %c0_i32 = arith.constant 0 : i32
    %c0_i32_0 = arith.constant 0 : i32
    return %c0_i32 : i32
  }
  func.func @transform_3(%arg0: i32) -> (i32, i32, i32) {
    %c0_i32 = arith.constant 0 : i32
    %c0_i32_0 = arith.constant 0 : i32
    %c0_i32_1 = arith.constant 0 : i32
    return %arg0, %c0_i32, %c0_i32_0 : i32, i32, i32
  }
}

</mosaic_0001>

<bundles_post_ra>
// kernel: tpu_custom_call.1
= control target key start
LH: loop header
LB: loop body
LE: loop exit
PB: predicated region body
PF: predicated region fallthrough
CT: control target
= control target key end

     0   :  { %8 = vsyncpa [#allocation3], 0  ;;  %s944_s0 = inlined_call_operand.hbm [shape: f32[2,8,256], index: 0, kind: input, shape index: {}]   ;;  %s945_s1 = inlined_call_operand.hbm [shape: f32[8,8], index: 1, kind: input, shape index: {}]   ;;  %s946_s2 = inlined_call_operand.vmem [shape: f32[2], index: 2, kind: input, shape index: {}]   ;;  %s947_s3 = inlined_call_operand.hbm [shape: f32[2,8,256], index: 3, kind: output, shape index: {}]  }
   0x1   :  { %10 = vsyncpa [#allocation3 + $0x1], 0 }
   0x2   :  { %11 = vsyncpa [#allocation7], 0 }
   0x3   :  { %12 = vsyncpa [#allocation5], 0 }
   0x4   :  { %13 = vsyncpa [#allocation4], 0 }
   0x5   :  { %15 = vsyncpa [#allocation4 + $0x1], 0  ;;  %s723_s12 = smov 0   ;;  %s725_s13 = smov 0  }
   0x6   :  { %s727_s14 = smov 0   ;;  %s729_s15 = smov 0  }
   0x7 LB: > { %s744_s16 = sadd.s32 4294967295, %s694_s15   ;;  %s440_s17 = sadd.s32 4294967294, %s694_s15   ;;  %s694_s15 = sphi %s729_s15, %s969_s15   ;;  %s690_s14 = sphi %s727_s14, %s968_s14   ;;  %s686_s13 = sphi %s725_s13, %s967_s13   ;;  %s682_s12 = sphi %s723_s12, %s966_s12  }
   0x8   : > { %p41_p0 = scmp.ne.s32.totalorder %s686_s13, %s682_s12  ;;  %p948_p1 = scmp.eq.s32.totalorder %s744_s16, 0 }
   0x9   : > { %p113_p3 = scmp.eq.s32.totalorder %s440_s17, 1  ;;  %p441_p5 = scmp.ge.s32.totalorder %s694_s15, 1 }
   0xa   : > { %p753_p4 = por %p948_p1, %p41_p0  ;;  %p120_p7 = scmp.lt.s32.totalorder %s694_s15, 3 }
   0xb   : > { %p758_p6 = por %p113_p3, %p41_p0  ;;  %s696_s21 = smov [#allocation6]  }
   0xc   : > { %s951_s18 = scalar_select %p753_p4, 1, 0 }
   0xd   : > { %s952_s19 = scalar_select %p758_p6, 1, 0 }
   0xe   : > { %p763_p8 = pnand %p441_p5, %p120_p7  ;;  %s133_s22 = sshll.u32 %s696_s21, 4  ;;  %s134_s22 = int_to_ptr.vmem [resolvable:$true] %s133_s22 }
   0xf   : > { %s144_s25 = sshll.u32 %s946_s2, 4  ;;  %s782_s27 = sadd.s32 1, %s694_s15   ;;  %s773_s25 = int_to_ptr.vmem [resolvable:$true] %s144_s25 }
  0x10   : > { %s953_s20 = scalar_select %p763_p8, 1, 0 }
  0x11   : > { %p481_p10 = pneg %p763_p8  ;;  %s25_s28 = ssub.s32 %s694_s15, %s782_s27 }
  0x12   : > { %s547_s4 = scalar_lea.hbm %s945_s1, 128 }
  0x13   : > { %p777_p11 = pnand %p481_p10, %p948_p1  ;;  %p548_p12 = scmp.ne.s32.totalorder %s945_s1, %s547_s4 }
  0x14   : > { %p554_p5 = scmp.lt.u32.totalorder %s547_s4, %s945_s1 }
  0x15   : > { %p549_p13 = pneg %p777_p11 }
  0x17   : > { %p550_p0 = pnand %p549_p13, %p548_p12 }
  0x19   : > { %p551_p3 = pneg %p550_p0 }
  0x1b   : > { %p556_p7 = pnand %p554_p5, %p551_p3 }
  0x1d   : > { %559 = shalt.err (!%p556_p7)
}
  0x1e   : > { %s560_s9 = scalar_lea.vmem %s134_s22, 128  ;;  %p568_p2 = scmp.lt.s32.totalorder %s134_s22, %s134_s22 }
  0x1f   : > { %p561_p10 = scmp.ne.s32.totalorder %s134_s22, %s560_s9  ;;  %p569_p6 = scmp.lt.s32.totalorder %s560_s9, %s560_s9 }
  0x21   : > { %p563_p9 = pnand %p561_p10, %p549_p13  ;;  %p570_p4 = por %p569_p6, %p568_p2 }
  0x23   : > { %p564_p1 = pneg %p563_p9 }
  0x25   : > { %p571_p8 = pnand %p570_p4, %p564_p1 }
  0x27   : > { %574 = shalt.err (!%p571_p8)
}
  0x28   : > { %484 = dma.hbm_to_vmem [thread:$0]  (!%p777_p11), %s945_s1, 128, %s134_s22, [#allocation7]  }
  0x29   : > { %s575_s17 = scalar_lea.vmem %s773_s25, 16  ;;  %p583_p2 = scmp.lt.s32.totalorder %s773_s25, %s773_s25 }
  0x2a   : > { %p576_p12 = scmp.ne.s32.totalorder %s773_s25, %s575_s17  ;;  %p584_p1 = scmp.lt.s32.totalorder %s575_s17, %s575_s17 }
  0x2c   : > { %p578_p9 = pnand %p576_p12, %p549_p13  ;;  %p585_p4 = por %p584_p1, %p583_p2 }
  0x2e   : > { %p579_p0 = pneg %p578_p9 }
  0x30   : > { %p586_p6 = pnand %p585_p4, %p579_p0 }
  0x32   : > { %589 = shalt.err (!%p586_p6)
}
  0x33   : > { %s697_s21 = smov [#allocation8]   ;;  %p26_p8 = scmp.eq.s32.totalorder %s25_s28, 0 }
  0x34   : > { %487 = dma.vmem_to_smem (!%p777_p11), %s773_s25, 16, %s697_s21, [#allocation5]  }
  0x35   : > { %s28_s22 = sadd.s32 1, %s690_s14  ;;  %p35_p13 = scmp.ne.s32.totalorder %s690_s14, %s686_s13 }
  0x36   : > { %p36_p3 = scmp.eq.s32.totalorder %s694_s15, 0  ;;  %p955_p7 = scmp.eq.s32.totalorder %s744_s16, 1 }
  0x37   : > { %s826_s23 = scalar_select %p26_p8, %s690_s14, %s28_s22  }
  0x38   : > { %p37_p5 = por %p36_p3, %p35_p13  ;;  %p830_p10 = por %p955_p7, %p35_p13 }
  0x39   : > { %p498_p12 = scmp.lt.s32.totalorder %s694_s15, 2  ;;  %s155_s26 = sand.u32 1, %s690_s14  }
  0x3a   : > { %s445_s29 = sshll.u32 %s155_s26, 4  ;;  %s460_s30 = sshll.u32 %s694_s15, 8 }
  0x3b   : > { %s840_s25 = scalar_lea.hbm %s944_s0, %s460_s30  ;;  %s159_s28 = scalar_lea.vmem [#allocation2], %s445_s29 }
  0x3c   : > { %s167_s6 = sshll.u32 %s159_s28, 4  ;;  %p844_p11 = pnand %p498_p12, %p37_p5  ;;  %s842_s6 = int_to_ptr.vmem [resolvable:$true] %s167_s6 }
  0x3d   : > { %s156_s8 = scalar_lea.sflag [#allocation3], %s155_s26  ;;  %s590_s9 = scalar_lea.hbm %s840_s25, 256 }
  0x3e   : > { %p591_p9 = scmp.ne.s32.totalorder %s840_s25, %s590_s9  ;;  %p592_p0 = pneg %p844_p11 }
  0x3f   : > { %s595_s17 = scalar_lea.hbm %s944_s0, 512  ;;  %p596_p4 = scmp.lt.u32.totalorder %s840_s25, %s944_s0 }
  0x40   : > { %p593_p2 = pnand %p592_p0, %p591_p9  ;;  %p597_p6 = scmp.lt.u32.totalorder %s595_s17, %s590_s9 }
  0x41   : > { %p599_p13 = scmp.lt.u32.totalorder %s590_s9, %s840_s25 }
  0x42   : > { %p594_p1 = pneg %p593_p2  ;;  %p598_p8 = por %p597_p6, %p596_p4 }
  0x44   : > { %p600_p3 = por %p599_p13, %p598_p8 }
  0x46   : > { %p601_p5 = pnand %p600_p3, %p594_p1 }
  0x48   : > { %604 = shalt.err (!%p601_p5)
}
  0x49   : > { %s605_s26 = scalar_lea.vmem %s842_s6, 256  ;;  %s698_s29 = smov [#allocation2]  }
  0x4a   : > { %p606_p7 = scmp.ne.s32.totalorder %s842_s6, %s605_s26  ;;  %s610_s30 = sshll.u32 %s698_s29, 4  ;;  %s611_s30 = int_to_ptr.vmem [resolvable:$false] %s610_s30 }
  0x4b   : > { %s612_s4 = scalar_lea.vmem %s611_s30, 512  ;;  %p613_p2 = scmp.lt.s32.totalorder %s842_s6, %s611_s30 }
  0x4c   : > { %p608_p12 = pnand %p606_p7, %p592_p0  ;;  %p614_p4 = scmp.lt.s32.totalorder %s612_s4, %s605_s26 }
  0x4e   : > { %p609_p9 = pneg %p608_p12  ;;  %p615_p6 = por %p614_p4, %p613_p2 }
  0x50   : > { %p616_p8 = pnand %p615_p6, %p609_p9 }
  0x52   : > { %619 = shalt.err (!%p616_p8)
}
  0x53   : > { %491 = dma.hbm_to_vmem [thread:$0]  (!%p844_p11), %s840_s25, 256, %s842_s6, %s156_s8  }
  0x54   : > { %p958_p1 = scmp.ne.s32.totalorder %s953_s20, 0 }
  0x55   : > { %s876_s5 = sand.u32 (!%p958_p1), 1, %s686_s13   ;;  %p959_p0 = scmp.ne.s32.totalorder (!%p958_p1), %s951_s18, 0 }
  0x56   : > { %176 = sbr.rel (%p958_p1) target bundleno = 662 (0x296), region = 32  ;;  %s449_s28 = sshll.u32 (!%p958_p1), %s876_s5, 4 }
  0x57   : > { %s179_s9 = scalar_lea.sflag (!%p958_p1), [#allocation3], %s876_s5  ;;  %s182_s10 = scalar_lea.vmem (!%p958_p1), [#allocation2], %s449_s28 }
  0x5d   : > { %665 = dma.done.wait (%p959_p0), %s179_s9, 256  }
  0x5e   : > { %667 = vsyncadd (%p959_p0), %s179_s9, 4294967040  ;;  %p960_p11 = scmp.eq.s32.totalorder %s744_s16, 0 }
  0x60   : > { %669 = dma.done.wait (%p960_p11), [#allocation7], 128   ;;  %p961_p13 = pmov %p960_p11 }
  0x61   : > { %p962_p3 = pmov %p960_p11 }
  0x62   : > { %671 = vsyncadd (%p961_p13), [#allocation7], 4294967168 }
  0x63   : > { %673 = dma.done.wait (%p962_p3), [#allocation5], 16   ;;  %p963_p5 = pmov %p962_p3 }
  0x65   : > { %675 = vsyncadd (%p963_p5), [#allocation5], 4294967280 }
  0x66   : > { %195 = sfence }
  0x67   : > { %v216_v0 = vld [vmem:[%s182_s10] sm:$0xff]  ;;  %v217_v1 = vld [vmem:[%s182_s10 + $0x8] sm:$0xff]  ;;  %v699_v6 = vmov 0.0   ;;  %vm700_vm0 = vmmov 0   ;;  %s214_s18 = sld [smem:[#allocation8]]  ;;  %s453_s20 = sld [smem:[#allocation8 + $0x1]] }
  0x68   : > { %v218_v2 = vadd.f32 %v217_v1, %v216_v0  ;;  %v221_v3 = vmul.f32 %v216_v0, %v216_v0  ;;  %v222_v4 = vmul.f32 %v217_v1, %v217_v1  ;;  %464 = vmatprep.subr.mxu0 %v699_v6  ;;  %466 = vmatprep.mubr.msk.f32.mxu0 %vm700_vm0, %v699_v6  ;;  %v243_v24 = vld [vmem:[#allocation6] sm:$0xff]  ;;  %vm244_vm3 = vcmask 64512   ;;  %s461_s25 = sshll.u32 %s744_s16, 8  ;;  %s213_s6 = scalar_lea.vmem [#allocation9], %s449_s28 }
  0x69   : > { %v701_v25 = vmov 0   ;;  %s348_s7 = sshll.u32 %s213_s6, 4  ;;  %s900_s17 = scalar_lea.hbm %s947_s3, %s461_s25  ;;  %s902_s7 = int_to_ptr.vmem [resolvable:$true] %s348_s7 }
  0x6a   : > { %219 = vadd.xlane.f32.xlu0 %v218_v2  ;;  %v223_v5 = vadd.f32 %v222_v4, %v221_v3  ;;  %539 = vset.pattern.permute.xlu1 %v701_v25  ;;  %s334_s21 = scalar_lea.sflag [#allocation4], %s876_s5  ;;  %s620_s16 = scalar_lea.vmem %s902_s7, 256 }
  0x6b   : > { %540 = vset.pattern.permute.xlu0 %v701_v25  ;;  %p621_p7 = scmp.ne.s32.totalorder %s902_s7, %s620_s16  ;;  %s702_s22 = smov [#allocation9]  }
  0x6c   : > { %s624_s26 = sshll.u32 %s702_s22, 4  ;;  %s625_s26 = int_to_ptr.vmem [resolvable:$false] %s624_s26 }
  0x6d   : > { %v238_v17 = vstv %s214_s18  ;;  %v240_v18 = vstv %s453_s20  ;;  %p622_p12 = pnand %p621_p7, %p830_p10  ;;  %s626_s29 = scalar_lea.vmem %s625_s26, 512 }
  0x6e   : > { %224 = vadd.xlane.f32.xlu0 %v223_v5  ;;  %p627_p2 = scmp.lt.s32.totalorder %s902_s7, %s625_s26  ;;  %p628_p4 = scmp.lt.s32.totalorder %s626_s29, %s620_s16 }
  0x6f   : > { %p623_p9 = pneg %p622_p12 }
  0x70   : > { %p629_p6 = por %p628_p4, %p627_p2 }
  0x72   : > { %p630_p8 = pnand %p629_p6, %p623_p9 }
  0xf7   : > { %v220_v7 = vpop.xlane.xlu0 %219 }
  0xf8   : > { %v226_v8 = vmul.f32 0.00390625, %v220_v7 }
  0xfa   : > { %v227_v9 = vmul.f32 %v226_v8, %v220_v7  ;;  %v239_v21 = vmul.f32 %v238_v17, %v226_v8 }
  0xfb   : > { %v225_v10 = vpop.xlane.xlu0 %224 }
  0xfc   : > { %v228_v11 = vsub.f32 %v225_v10, %v227_v9 }
  0xfe   : > { %v229_v12 = vmul.f32 0.003921569, %v228_v11 }
 0x100   : > { %v230_v13 = vmax.f32 %v229_v12, 0.0 }
 0x102   : > { %541 = vrsqrt.f32 %v230_v13  ;;  %vm233_vm1 = vcmp.eq.f32.partialorder %v230_v13, inf  ;;  %v236_v16 = vand.u32 2147483648, %v230_v13  ;;  %vm235_vm2 = vcmp.eq.f32.partialorder %v230_v13, 0.0 }
 0x10c   : > { %v542_v14 = vpop.eup %541 }
 0x10d   : > { %v232_v15 = vmul.f32 %v542_v14, %v230_v13 }
 0x10f   : > { %v234_v19 = vsel %vm233_vm1, %v230_v13, %v232_v15 }
 0x110   : > { %v237_v20 = vsel %vm235_vm2, %v236_v16, %v234_v19 }
 0x111   : > { %v241_v22 = vmul.f32 %v240_v18, %v237_v20 }
 0x113   : > { %v242_v23 = vadd.f32 %v241_v22, %v239_v21 }
 0x115   : > { %465 = vmatpush3.msra.mxu0 %v242_v23 }
 0x116   : > { %467 = vmatmul.mubr.msk.f32.vlgmr.msra.gmra.mrb[0].mxu0 %vm244_vm3, %v243_v24 }
 0x1e9   : > { %v314_v26 = vpop.f32.mrb[0].mxu0 }
 0x1ea   : > { %v318_v27 = vsub.f32 0.0, %v314_v26  ;;  %v468_v28 = vpop.f32.mrb[1].mxu0 }
 0x1ec   : > { %v319_v29 = vmul.f32 1.442695, %v318_v27 }
 0x1ee   : > { %543 = vpow2.f32 %v319_v29 }
 0x1f8   : > { %v544_v30 = vpop.eup %543 }
 0x1f9   : > { %v321_v31 = vadd.f32 1.0, %v544_v30 }
 0x1fb   : > { %545 = vrcp.f32 %v321_v31 }
 0x205   : > { %v546_v32 = vpop.eup %545 }
 0x206   : > { %326 = vperm.xlu1 %539, %v546_v32  }
 0x285   : > { %v327_v33 = vpop.permute.xlu1 %326 }
 0x286   : > { %v329_v34 = vmul.f32 %v327_v33, %v216_v0  ;;  %v330_v35 = vmul.f32 %v327_v33, %v217_v1 }
 0x288   : > { %331 = vst [vmem:[%s213_s6] sm:$0xff] %v329_v34  ;;  %332 = vst [vmem:[%s213_s6 + $0x8] sm:$0xff] %v330_v35 }
 0x289   : > { %633 = shalt.err (!%p630_p8)
}
 0x28a   : > { %s634_s30 = scalar_lea.hbm %s900_s17, 256  ;;  %s638_s28 = scalar_lea.hbm %s947_s3, 512 }
 0x28b   : > { %p635_p1 = scmp.ne.s32.totalorder %s900_s17, %s634_s30  ;;  %p639_p13 = scmp.lt.u32.totalorder %s900_s17, %s947_s3 }
 0x28c   : > { %p640_p3 = scmp.lt.u32.totalorder %s638_s28, %s634_s30  ;;  %p642_p7 = scmp.lt.u32.totalorder %s634_s30, %s900_s17 }
 0x28d   : > { %p636_p0 = pnand %p635_p1, %p830_p10 }
 0x28e   : > { %p641_p5 = por %p640_p3, %p639_p13 }
 0x28f   : > { %p637_p11 = pneg %p636_p0 }
 0x290   : > { %p643_p12 = por %p642_p7, %p641_p5 }
 0x292   : > { %p644_p9 = pnand %p643_p12, %p637_p11 }
 0x294   : > { %647 = shalt.err (!%p644_p9)
}
 0x295   : > { %479 = dma.vmem_to_hbm [thread:$0]  (%p830_p10), %s902_s7, 256, %s900_s17, %s334_s21  }
 0x296 PF: > { %s360_s18 = sand.u32 1, %s682_s12   ;;  %p964_p2 = scmp.ne.s32.totalorder %s952_s19, 0 }
 0x297   : > { %p965_p4 = scmp.ge.s32.totalorder %s694_s15, 2  ;;  %s361_s20 = scalar_lea.sflag [#allocation4], %s360_s18 }
 0x299   : > { %p493_p6 = pnand %p965_p4, %p964_p2 }
 0x29b   : > { %677 = dma.done.wait (!%p493_p6), %s361_s20, 256  }
 0x29c   : > { %679 = vsyncadd (!%p493_p6), %s361_s20, 4294967040  ;;  %p18_p8 = scmp.ge.s32.totalorder %s782_s27, 4   ;;  %s966_s12 = smov %s686_s13 }
 0x29d   : > { %s967_s13 = smov %s690_s14  ;;  %s968_s14 = smov %s826_s23 }
 0x29e   : > { %s969_s15 = smov %s782_s27  ;;  %20 = sbr.rel (!%p18_p8) target bundleno = 7 (0x7), region = 86 }
 0x2a5   :  { %366 = vsyncpa [#allocation3], 1 }
 0x2a6   :  { %368 = vsyncpa [#allocation3 + $0x1], 1 }
 0x2a7   :  { %369 = vsyncpa [#allocation7], 1 }
 0x2a8   :  { %370 = vsyncpa [#allocation4], 1 }
 0x2a9   :  { %372 = vsyncpa [#allocation4 + $0x1], 1 }
 0x2aa   :  { %373 = vsyncpa [#allocation5], 1 }
 0x2ab   :  { %375 = vsyncpa [#allocation5 + $0x1], 1 }

</bundles_post_ra>
